<compile_context>
chip_gen: v7x
topology: tpu7x:2x2x1
jax: 0.10.0
libtpu: 0.0.40
codegen_flags: <defaults>
</compile_context>

<pallas_src>
import functools

import jax
import jax.numpy as jnp
from jax.experimental import pallas as pl
from jax.experimental.pallas import tpu as pltpu

EPS = 1e-5
NEG_SLOPE = 0.2


def _vmem_budget_bytes() -> int:
    """Scoped-VMEM budget with headroom: ~48 MiB on 64-MiB chips, ~110 MiB on 128-MiB chips."""
    try:
        cap = int(pltpu.get_tpu_info().vmem_capacity_bytes)
    except Exception:
        cap = 64 << 20  # conservative fallback (v7x-sized)
    return max(min(cap - (16 << 20), 110 << 20), 32 << 20)


# ----------------------------------------------------------------------------------------
# Fused single-pass kernel: whole image per grid step (used when it fits the VMEM budget).
# ----------------------------------------------------------------------------------------
def _fused_kernel(x_ref, w_ref, o_ref, *, matmul_dtype):
    # x_ref: (1, Cin, HW)     f32
    # w_ref: (1, 4*cpg, Cin)  f32 (tap-major rows within this channel group)
    # o_ref: (1, 4, cpg, HW)  lane-dense (last dim = H*W)
    x = x_ref[0]
    w = w_ref[0]
    cpg = w.shape[0] // 4
    hw = x.shape[-1]

    y = jnp.dot(w.astype(matmul_dtype), x.astype(matmul_dtype),
                preferred_element_type=jnp.float32)            # (4*cpg, HW) f32

    # InstanceNorm stats per channel over 4 taps * H*W positions (f32).
    rs = jnp.sum(y, axis=-1, keepdims=True)                     # (4*cpg, 1)
    rss = jnp.sum(y * y, axis=-1, keepdims=True)
    cs = rs[0:cpg] + rs[cpg:2 * cpg] + rs[2 * cpg:3 * cpg] + rs[3 * cpg:4 * cpg]
    css = rss[0:cpg] + rss[cpg:2 * cpg] + rss[2 * cpg:3 * cpg] + rss[3 * cpg:4 * cpg]

    inv_n = 1.0 / (4.0 * hw)
    mean = cs * inv_n
    var = jnp.maximum(css * inv_n - mean * mean, 0.0)
    inv = jax.lax.rsqrt(var + EPS)

    mean_r = jnp.concatenate([mean, mean, mean, mean], axis=0)  # (4*cpg, 1)
    inv_r = jnp.concatenate([inv, inv, inv, inv], axis=0)

    yn = (y - mean_r) * inv_r
    yn = jnp.where(yn >= 0.0, yn, NEG_SLOPE * yn).astype(o_ref.dtype)

    for t in range(4):
        o_ref[0, t] = yn[t * cpg:(t + 1) * cpg]


# ----------------------------------------------------------------------------------------
# Tiled two-pass path (spatial tiling + two-pass InstanceNorm), for v7x / large images.
# ----------------------------------------------------------------------------------------
def _stats_kernel(x_ref, w_ref, s_ref, *, matmul_dtype):
    # x_ref: (1, Cin, tile); w_ref: (4*Cout, Cin); s_ref: (1, 4*Cout, 2) accumulator.
    @pl.when(pl.program_id(1) == 0)
    def _():
        s_ref[...] = jnp.zeros_like(s_ref)

    y = jnp.dot(w_ref[...].astype(matmul_dtype), x_ref[0].astype(matmul_dtype),
                preferred_element_type=jnp.float32)             # (4*Cout, tile)
    rs = jnp.sum(y, axis=-1, keepdims=True)
    rss = jnp.sum(y * y, axis=-1, keepdims=True)
    s_ref[0] += jnp.concatenate([rs, rss], axis=-1)             # (4*Cout, 2)


def _norm_kernel(x_ref, w_ref, ss_ref, o_ref, *, matmul_dtype):
    # x_ref: (1, Cin, tile); w_ref: (4*Cout, Cin); ss_ref: (1, 4*Cout, 2) affine
    # o_ref: (1, 4, Cout, tile)
    w = w_ref[...]
    cout = w.shape[0] // 4
    y = jnp.dot(w.astype(matmul_dtype), x_ref[0].astype(matmul_dtype),
                preferred_element_type=jnp.float32)             # (4*Cout, tile)
    scale = ss_ref[0, :, 0:1]                                   # (4*Cout, 1)
    shift = ss_ref[0, :, 1:2]
    yn = y * scale + shift
    yn = jnp.where(yn >= 0.0, yn, NEG_SLOPE * yn).astype(o_ref.dtype)
    for t in range(4):
        o_ref[0, t] = yn[t * cout:(t + 1) * cout]


# ----------------------------------------------------------------------------------------
# Wrapper
# ----------------------------------------------------------------------------------------
def transpose_conv_block(x_nchw: jax.Array, weight: jax.Array, *,
                         matmul_dtype=jnp.float32,
                         channel_groups: int = 1,
                         hw_tile=None,
                         force_tiled: bool = False) -> jax.Array:
    """
    Args:
      x_nchw: (N, Cin, H, W) float32.
      weight: (2, 2, Cin, Cout) float32 -- ConvTranspose2d weight with taps first
              (from PyTorch's (Cin, Cout, kH, kW): w.permute(2, 3, 0, 1)).
      matmul_dtype: dtype fed to the MXU (f32 default; bf16 opt-in, stats stay f32).
      channel_groups: optional explicit split of Cout over a second grid axis (fused path).
      hw_tile / force_tiled: control the spatially tiled two-pass path.
    Returns:
      (N, Cout, 2H, 2W) float32.
    """
    N, Cin, H, W = x_nchw.shape
    if weight.ndim != 4 or weight.shape[0] != 2 or weight.shape[1] != 2 \
            or weight.shape[2] != Cin:
        raise ValueError(f"weight must have shape (2, 2, {Cin}, Cout); got {weight.shape}")
    Cout = weight.shape[-1]
    HW = H * W

    if Cout % channel_groups != 0:
        raise ValueError("Cout must be divisible by channel_groups")
    cpg = Cout // channel_groups
    if channel_groups > 1 and cpg % 8 != 0:
        raise ValueError("channel_groups must keep Cout/channel_groups a multiple of 8 "
                         "(f32 sublane tile alignment for per-tap stores)")

    # Weight -> tap-major rows: row t*Cout + c  (tap t = kh*2 + kw).  Tiny, done once.
    w_all = jnp.transpose(weight, (0, 1, 3, 2)).reshape(4 * Cout, Cin)
    # NCHW -> (N, Cin, H*W): free reshape, H*W lane-dense; no input transpose.
    x2 = x_nchw.reshape(N, Cin, HW)

    io_b = jnp.dtype(x_nchw.dtype).itemsize
    mm_b = jnp.dtype(matmul_dtype).itemsize
    budget = _vmem_budget_bytes()

    # Conservative fused-path VMEM estimate: double-buffered blocks + y, y*y/yn temporaries
    # + MXU operand casts + slack.
    fused_need = (2 * (Cin * HW + 4 * cpg * Cin + 4 * cpg * HW) * io_b
                  + 3 * (4 * cpg * HW) * 4
                  + (Cin * HW + 4 * cpg * Cin) * mm_b
                  + (2 << 20))

    use_tiled = force_tiled or fused_need > budget
    tile = None
    tiled_need = 0
    if use_tiled:
        candidates = [int(hw_tile)] if hw_tile else [8192, 4096, 2048, 1024, 512, 256, 128]
        for t in candidates:
            if t >= 128 and HW % t == 0:
                need = (2 * (Cin * t + 4 * Cout * Cin + 4 * Cout * 2 + 4 * Cout * t) * io_b
                        + 3 * (4 * Cout * t) * 4
                        + (Cin * t + 4 * Cout * Cin) * mm_b
                        + (2 << 20))
                if need <= budget:
                    tile, tiled_need = t, need
                    break
        if tile is None:
            use_tiled = False  # no dividing tile fits; fall back to the fused path

    if not use_tiled:
        # ---------------- fused single-pass path ----------------
        w_g = (w_all.reshape(4, channel_groups, cpg, Cin)
               .transpose(1, 0, 2, 3)
               .reshape(channel_groups, 4 * cpg, Cin))
        vmem_limit = int(min(budget, max(fused_need, 32 << 20)))
        out4 = pl.pallas_call(
            functools.partial(_fused_kernel, matmul_dtype=matmul_dtype),
            out_shape=jax.ShapeDtypeStruct((N, 4, Cout, HW), x_nchw.dtype),
            grid=(N, channel_groups),
            in_specs=[
                pl.BlockSpec((1, Cin, HW), lambda n, g: (n, 0, 0)),
                pl.BlockSpec((1, 4 * cpg, Cin), lambda n, g: (g, 0, 0)),
            ],
            out_specs=pl.BlockSpec((1, 4, cpg, HW), lambda n, g: (n, 0, g, 0)),
            compiler_params=pltpu.CompilerParams(
                dimension_semantics=("parallel", "parallel"),
                vmem_limit_bytes=vmem_limit),
        )(x2, w_g)
    else:
        # ---------------- spatially tiled two-pass path ----------------
        n_tiles = HW // tile
        vmem_limit = int(min(budget, max(tiled_need, 32 << 20)))

        # Pass 1: accumulate per-(tap,channel) sum / sumsq across H*W tiles.
        stats = pl.pallas_call(
            functools.partial(_stats_kernel, matmul_dtype=matmul_dtype),
            out_shape=jax.ShapeDtypeStruct((N, 4 * Cout, 2), jnp.float32),
            grid=(N, n_tiles),
            in_specs=[
                pl.BlockSpec((1, Cin, tile), lambda n, t: (n, 0, t)),
                pl.BlockSpec((4 * Cout, Cin), lambda n, t: (0, 0)),
            ],
            out_specs=pl.BlockSpec((1, 4 * Cout, 2), lambda n, t: (n, 0, 0)),
            compiler_params=pltpu.CompilerParams(
                dimension_semantics=("parallel", "arbitrary"),
                vmem_limit_bytes=vmem_limit),
        )(x2, w_all)

        # Tiny per-channel finalize in XLA: mean / inv-std -> per-row (scale, shift).
        sums = stats.reshape(N, 4, Cout, 2)
        csum = jnp.sum(sums[..., 0], axis=1)                    # (N, Cout)
        csq = jnp.sum(sums[..., 1], axis=1)
        inv_n = 1.0 / (4.0 * HW)
        mean = csum * inv_n
        var = jnp.maximum(csq * inv_n - mean * mean, 0.0)
        inv = jax.lax.rsqrt(var + EPS)
        scale_rows = jnp.broadcast_to(inv[:, None, :], (N, 4, Cout)).reshape(N, 4 * Cout)
        shift_rows = jnp.broadcast_to((-mean * inv)[:, None, :],
                                      (N, 4, Cout)).reshape(N, 4 * Cout)
        ss = jnp.stack([scale_rows, shift_rows], axis=-1).astype(jnp.float32)

        # Pass 2: recompute the matmul per tile, apply affine + LeakyReLU, write output.
        out4 = pl.pallas_call(
            functools.partial(_norm_kernel, matmul_dtype=matmul_dtype),
            out_shape=jax.ShapeDtypeStruct((N, 4, Cout, HW), x_nchw.dtype),
            grid=(N, n_tiles),
            in_specs=[
                pl.BlockSpec((1, Cin, tile), lambda n, t: (n, 0, t)),
                pl.BlockSpec((4 * Cout, Cin), lambda n, t: (0, 0)),
                pl.BlockSpec((1, 4 * Cout, 2), lambda n, t: (n, 0, 0)),
            ],
            out_specs=pl.BlockSpec((1, 4, Cout, tile), lambda n, t: (n, 0, 0, t)),
            compiler_params=pltpu.CompilerParams(
                dimension_semantics=("parallel", "parallel"),
                vmem_limit_bytes=vmem_limit),
        )(x2, w_all, ss)

    # Tap interleave + back to NCHW.  This single transpose is forced by the module's NCHW
    # interface; see the TODO(synk) at the top for the in-kernel free-reshape layout.
    y = out4.reshape(N, 2, 2, Cout, H, W)            # (N, kh, kw, C, H, W)
    y = jnp.transpose(y, (0, 3, 4, 1, 5, 2))         # (N, C, H, kh, W, kw)
    return y.reshape(N, Cout, 2 * H, 2 * W)


def reference_forward(x_nchw: jax.Array, weight: jax.Array) -> jax.Array:
    """Pure-JAX reference with identical semantics (correctness check)."""
    N, Cin, H, W = x_nchw.shape
    Cout = weight.shape[-1]
    # y[n, o, 2h+a, 2w+b] = sum_c x[n,c,h,w] * w[a,b,c,o]
    y = jnp.einsum("nchw,abco->nohawb", x_nchw, weight)
    y = y.reshape(N, Cout, 2 * H, 2 * W)
    mean = jnp.mean(y, axis=(-2, -1), keepdims=True)
    var = jnp.mean((y - mean) ** 2, axis=(-2, -1), keepdims=True)
    y = (y - mean) * jax.lax.rsqrt(var + EPS)
    return jnp.where(y >= 0.0, y, NEG_SLOPE * y)


if __name__ == "__main__":
    key = jax.random.PRNGKey(0)
    kx, kw, kx1, kw1, kx2, kw2 = jax.random.split(key, 6)

    # Case 1: fused path, default exact f32 MXU math.
    x = jax.random.normal(kx, (2, 4, 16, 16), dtype=jnp.float32)
    w = jax.random.normal(kw, (2, 2, 4, 8), dtype=jnp.float32) * 0.1
    ref = reference_forward(x, w)
    out = jax.block_until_ready(transpose_conv_block(x, w))
    assert out.shape == (2, 8, 32, 32)
    assert jnp.allclose(out, ref, atol=1e-4, rtol=1e-4)

    # Case 2: bf16 MXU operands (opt-in), f32 accumulation & stats.
    out_bf16 = jax.block_until_ready(
        transpose_conv_block(x, w, matmul_dtype=jnp.bfloat16))
    assert out_bf16.shape == (2, 8, 32, 32)
    assert jnp.allclose(out_bf16, ref, atol=3e-2, rtol=3e-2)

    # Case 3: explicit channel grouping (cpg = 8 keeps sublane alignment).
    x1 = jax.random.normal(kx1, (1, 4, 16, 16), dtype=jnp.float32)
    w1 = jax.random.normal(kw1, (2, 2, 4, 16), dtype=jnp.float32) * 0.1
    out1 = jax.block_until_ready(transpose_conv_block(x1, w1, channel_groups=2))
    ref1 = reference_forward(x1, w1)
    assert out1.shape == (1, 16, 32, 32)
    assert jnp.allclose(out1, ref1, atol=1e-4, rtol=1e-4)

    # Case 4: spatially tiled two-pass path (forced here; auto-selected for v7x / large HW).
    x2_ = jax.random.normal(kx2, (1, 8, 16, 32), dtype=jnp.float32)   # HW=512 -> 4 tiles
    w2_ = jax.random.normal(kw2, (2, 2, 8, 8), dtype=jnp.float32) * 0.1
    out2 = jax.block_until_ready(
        transpose_conv_block(x2_, w2_, force_tiled=True, hw_tile=128))
    ref2 = reference_forward(x2_, w2_)
    assert out2.shape == (1, 8, 32, 64)
    assert jnp.allclose(out2, ref2, atol=1e-4, rtol=1e-4)

    print("KERNEL_OK")
</pallas_src>

<mosaic_0001>
module attributes {stable_mosaic.version = 11 : i64} {
  func.func @_fused_kernel(%arg0: i32, %arg1: i32, %arg2: memref<1x4x256xf32, #tpu.memory_space<vmem>>, %arg3: memref<1x32x4xf32, #tpu.memory_space<vmem>>, %arg4: memref<1x4x8x256xf32, #tpu.memory_space<vmem>>) attributes {dimension_semantics = [#tpu.dimension_semantics<parallel>, #tpu.dimension_semantics<parallel>], iteration_bounds = array<i64: 2, 1>, scalar_prefetch = 0 : i64, scratch_operands = 0 : i64, tpu.core_type = #tpu.core_type<tc>, window_params = [{transform_indices = @transform_0, window_bounds = array<i64: 1, 4, 256>}, {transform_indices = @transform_1, window_bounds = array<i64: 1, 32, 4>}, {transform_indices = @transform_2, window_bounds = array<i64: 1, 4, 8, 256>}]} {
    %c0 = arith.constant 0 : index
    %c0_0 = arith.constant 0 : index
    %c0_1 = arith.constant 0 : index
    %0 = vector.load %arg2[%c0, %c0_0, %c0_1] : memref<1x4x256xf32, #tpu.memory_space<vmem>>, vector<1x4x256xf32>
    %1 = vector.shape_cast %0 : vector<1x4x256xf32> to vector<4x256xf32>
    %c0_2 = arith.constant 0 : index
    %c0_3 = arith.constant 0 : index
    %c0_4 = arith.constant 0 : index
    %2 = vector.load %arg3[%c0_2, %c0_3, %c0_4] : memref<1x32x4xf32, #tpu.memory_space<vmem>>, vector<1x32x4xf32>
    %3 = vector.shape_cast %2 : vector<1x32x4xf32> to vector<32x4xf32>
    %cst = arith.constant dense<0.000000e+00> : vector<32x256xf32>
    %4 = tpu.matmul %3, %1, %cst {dimension_numbers = #tpu.dot_dimension_numbers<[1], [0], [0], [1], [0, 0, 1, 1], [], []>} : vector<32x4xf32>, vector<4x256xf32>, vector<32x256xf32> -> vector<32x256xf32>
    %cst_5 = arith.constant dense<0.000000e+00> : vector<32xf32>
    %5 = vector.multi_reduction <add>, %4, %cst_5 [1] : vector<32x256xf32> to vector<32xf32>
    %6 = vector.shape_cast %5 : vector<32xf32> to vector<32x1xf32>
    %7 = arith.mulf %4, %4 : vector<32x256xf32>
    %cst_6 = arith.constant dense<0.000000e+00> : vector<32xf32>
    %8 = vector.multi_reduction <add>, %7, %cst_6 [1] : vector<32x256xf32> to vector<32xf32>
    %9 = vector.shape_cast %8 : vector<32xf32> to vector<32x1xf32>
    %10 = vector.extract_strided_slice %6 {offsets = [0, 0], sizes = [8, 1], strides = [1, 1]} : vector<32x1xf32> to vector<8x1xf32>
    %11 = vector.extract_strided_slice %6 {offsets = [8, 0], sizes = [8, 1], strides = [1, 1]} : vector<32x1xf32> to vector<8x1xf32>
    %12 = arith.addf %10, %11 : vector<8x1xf32>
    %13 = vector.extract_strided_slice %6 {offsets = [16, 0], sizes = [8, 1], strides = [1, 1]} : vector<32x1xf32> to vector<8x1xf32>
    %14 = arith.addf %12, %13 : vector<8x1xf32>
    %15 = vector.extract_strided_slice %6 {offsets = [24, 0], sizes = [8, 1], strides = [1, 1]} : vector<32x1xf32> to vector<8x1xf32>
    %16 = arith.addf %14, %15 : vector<8x1xf32>
    %17 = vector.extract_strided_slice %9 {offsets = [0, 0], sizes = [8, 1], strides = [1, 1]} : vector<32x1xf32> to vector<8x1xf32>
    %18 = vector.extract_strided_slice %9 {offsets = [8, 0], sizes = [8, 1], strides = [1, 1]} : vector<32x1xf32> to vector<8x1xf32>
    %19 = arith.addf %17, %18 : vector<8x1xf32>
    %20 = vector.extract_strided_slice %9 {offsets = [16, 0], sizes = [8, 1], strides = [1, 1]} : vector<32x1xf32> to vector<8x1xf32>
    %21 = arith.addf %19, %20 : vector<8x1xf32>
    %22 = vector.extract_strided_slice %9 {offsets = [24, 0], sizes = [8, 1], strides = [1, 1]} : vector<32x1xf32> to vector<8x1xf32>
    %23 = arith.addf %21, %22 : vector<8x1xf32>
    %cst_7 = arith.constant 9.765625E-4 : f32
    %24 = vector.broadcast %cst_7 : f32 to vector<8x1xf32>
    %25 = arith.mulf %16, %24 : vector<8x1xf32>
    %cst_8 = arith.constant 9.765625E-4 : f32
    %26 = vector.broadcast %cst_8 : f32 to vector<8x1xf32>
    %27 = arith.mulf %23, %26 : vector<8x1xf32>
    %28 = arith.mulf %25, %25 : vector<8x1xf32>
    %29 = arith.subf %27, %28 : vector<8x1xf32>
    %cst_9 = arith.constant 0.000000e+00 : f32
    %30 = vector.broadcast %cst_9 : f32 to vector<8x1xf32>
    %31 = arith.maximumf %29, %30 : vector<8x1xf32>
    %cst_10 = arith.constant 9.99999974E-6 : f32
    %32 = vector.broadcast %cst_10 : f32 to vector<8x1xf32>
    %33 = arith.addf %31, %32 : vector<8x1xf32>
    %34 = math.rsqrt %33 : vector<8x1xf32>
    %35 = tpu.concatenate %25, %25, %25, %25 in 0 : vector<8x1xf32>, vector<8x1xf32>, vector<8x1xf32>, vector<8x1xf32> -> vector<32x1xf32>
    %36 = tpu.concatenate %34, %34, %34, %34 in 0 : vector<8x1xf32>, vector<8x1xf32>, vector<8x1xf32>, vector<8x1xf32> -> vector<32x1xf32>
    %37 = vector.broadcast %35 : vector<32x1xf32> to vector<32x256xf32>
    %38 = arith.subf %4, %37 : vector<32x256xf32>
    %39 = vector.broadcast %36 : vector<32x1xf32> to vector<32x256xf32>
    %40 = arith.mulf %38, %39 : vector<32x256xf32>
    %cst_11 = arith.constant 0.000000e+00 : f32
    %41 = vector.broadcast %cst_11 : f32 to vector<32x256xf32>
    %42 = arith.cmpf oge, %40, %41 : vector<32x256xf32>
    %cst_12 = arith.constant 2.000000e-01 : f32
    %43 = vector.broadcast %cst_12 : f32 to vector<32x256xf32>
    %44 = arith.mulf %43, %40 : vector<32x256xf32>
    %45 = arith.select %42, %40, %44 : vector<32x256xi1>, vector<32x256xf32>
    %46 = vector.extract_strided_slice %45 {offsets = [0, 0], sizes = [8, 256], strides = [1, 1]} : vector<32x256xf32> to vector<8x256xf32>
    %c0_13 = arith.constant 0 : index
    %c0_14 = arith.constant 0 : index
    %c0_15 = arith.constant 0 : index
    %c0_16 = arith.constant 0 : index
    %47 = vector.load %arg4[%c0_13, %c0_14, %c0_15, %c0_16] : memref<1x4x8x256xf32, #tpu.memory_space<vmem>>, vector<1x1x8x256xf32>
    %48 = vector.shape_cast %47 : vector<1x1x8x256xf32> to vector<8x256xf32>
    %49 = vector.shape_cast %46 : vector<8x256xf32> to vector<1x1x8x256xf32>
    tpu.vector_store %arg4[%c0_13, %c0_14, %c0_15, %c0_16], %49 {strides = array<i32>} : memref<1x4x8x256xf32, #tpu.memory_space<vmem>>, vector<1x1x8x256xf32>,
    %50 = vector.extract_strided_slice %45 {offsets = [8, 0], sizes = [8, 256], strides = [1, 1]} : vector<32x256xf32> to vector<8x256xf32>
    %c0_17 = arith.constant 0 : index
    %c1 = arith.constant 1 : index
    %c0_18 = arith.constant 0 : index
    %c0_19 = arith.constant 0 : index
    %51 = vector.load %arg4[%c0_17, %c1, %c0_18, %c0_19] : memref<1x4x8x256xf32, #tpu.memory_space<vmem>>, vector<1x1x8x256xf32>
    %52 = vector.shape_cast %51 : vector<1x1x8x256xf32> to vector<8x256xf32>
    %53 = vector.shape_cast %50 : vector<8x256xf32> to vector<1x1x8x256xf32>
    tpu.vector_store %arg4[%c0_17, %c1, %c0_18, %c0_19], %53 {strides = array<i32>} : memref<1x4x8x256xf32, #tpu.memory_space<vmem>>, vector<1x1x8x256xf32>,
    %54 = vector.extract_strided_slice %45 {offsets = [16, 0], sizes = [8, 256], strides = [1, 1]} : vector<32x256xf32> to vector<8x256xf32>
    %c0_20 = arith.constant 0 : index
    %c2 = arith.constant 2 : index
    %c0_21 = arith.constant 0 : index
    %c0_22 = arith.constant 0 : index
    %55 = vector.load %arg4[%c0_20, %c2, %c0_21, %c0_22] : memref<1x4x8x256xf32, #tpu.memory_space<vmem>>, vector<1x1x8x256xf32>
    %56 = vector.shape_cast %55 : vector<1x1x8x256xf32> to vector<8x256xf32>
    %57 = vector.shape_cast %54 : vector<8x256xf32> to vector<1x1x8x256xf32>
    tpu.vector_store %arg4[%c0_20, %c2, %c0_21, %c0_22], %57 {strides = array<i32>} : memref<1x4x8x256xf32, #tpu.memory_space<vmem>>, vector<1x1x8x256xf32>,
    %58 = vector.extract_strided_slice %45 {offsets = [24, 0], sizes = [8, 256], strides = [1, 1]} : vector<32x256xf32> to vector<8x256xf32>
    %c0_23 = arith.constant 0 : index
    %c3 = arith.constant 3 : index
    %c0_24 = arith.constant 0 : index
    %c0_25 = arith.constant 0 : index
    %59 = vector.load %arg4[%c0_23, %c3, %c0_24, %c0_25] : memref<1x4x8x256xf32, #tpu.memory_space<vmem>>, vector<1x1x8x256xf32>
    %60 = vector.shape_cast %59 : vector<1x1x8x256xf32> to vector<8x256xf32>
    %61 = vector.shape_cast %58 : vector<8x256xf32> to vector<1x1x8x256xf32>
    tpu.vector_store %arg4[%c0_23, %c3, %c0_24, %c0_25], %61 {strides = array<i32>} : memref<1x4x8x256xf32, #tpu.memory_space<vmem>>, vector<1x1x8x256xf32>,
    return
  }
  func.func @transform_0(%arg0: i32, %arg1: i32) -> (i32, i32, i32) {
    %c0_i32 = arith.constant 0 : i32
    %c0_i32_0 = arith.constant 0 : i32
    %c0_i32_1 = arith.constant 0 : i32
    return %arg0, %c0_i32, %c0_i32_0 : i32, i32, i32
  }
  func.func @transform_1(%arg0: i32, %arg1: i32) -> (i32, i32, i32) {
    %c0_i32 = arith.constant 0 : i32
    %c0_i32_0 = arith.constant 0 : i32
    %c0_i32_1 = arith.constant 0 : i32
    return %arg1, %c0_i32, %c0_i32_0 : i32, i32, i32
  }
  func.func @transform_2(%arg0: i32, %arg1: i32) -> (i32, i32, i32, i32) {
    %c0_i32 = arith.constant 0 : i32
    %c0_i32_0 = arith.constant 0 : i32
    %c0_i32_1 = arith.constant 0 : i32
    return %arg0, %c0_i32, %arg1, %c0_i32_0 : i32, i32, i32, i32
  }
}

</mosaic_0001>

<bundles_post_ra>
// kernel: tpu_custom_call.1
= control target key start
LH: loop header
LB: loop body
LE: loop exit
PB: predicated region body
PF: predicated region fallthrough
CT: control target
= control target key end

     0   :  { %7 = vsyncpa [#allocation3], 0  ;;  %s863_s0 = inlined_call_operand.vmem [shape: f32[2,4,256], index: 0, kind: input, shape index: {}]   ;;  %s864_s1 = inlined_call_operand.vmem [shape: f32[1,32,4], index: 1, kind: input, shape index: {}]   ;;  %s865_s2 = inlined_call_operand.hbm [shape: f32[2,4,8,256], index: 2, kind: output, shape index: {}]  }
   0x1   :  { %9 = vsyncpa [#allocation3 + $0x1], 0  ;;  %s694_s9 = smov 0   ;;  %s696_s10 = smov 0  }
   0x2   :  { %s698_s11 = smov 0   ;;  %s700_s12 = smov 0  }
   0x3   :  { %s702_s13 = smov 0   ;;  %s704_s14 = smov 0  }
   0x4 LB: > { %s500_s15 = sadd.s32 4294967295, %s672_s14   ;;  %s501_s16 = sadd.s32 4294967294, %s672_s14   ;;  %s672_s14 = sphi %s704_s14, %s15_s14   ;;  %s668_s13 = sphi %s702_s13, %s872_s13   ;;  %s664_s12 = sphi %s700_s12, %s871_s12   ;;  %s660_s11 = sphi %s698_s11, %s870_s11   ;;  %s656_s10 = sphi %s696_s10, %s869_s10   ;;  %s652_s9 = sphi %s694_s9, %s868_s9  }
   0x5   : > { %s27_s17 = sadd.s32 1, %s668_s13  ;;  %s88_s18 = sadd.s32 1, %s660_s11 }
   0x6   : > { %p29_p0 = scmp.ge.s32.totalorder %s27_s17, 2  ;;  %p98_p1 = scmp.ne.s32.totalorder %s660_s11, %s656_s10 }
   0x7   : > { %p99_p2 = scmp.eq.s32.totalorder %s500_s15, 1  ;;  %p104_p3 = scmp.ne.s32.totalorder %s656_s10, %s652_s9 }
   0x8   : > { %s874_s17 = smov (%p29_p0, %s27_s17), 0  ;;  %p105_p5 = scmp.eq.s32.totalorder %s501_s16, 1 }
   0x9   : > { %p734_p4 = por %p99_p2, %p98_p1  ;;  %s83_s20 = ssub.s32 %s668_s13, %s874_s17 }
   0xa   : > { %p505_p6 = scmp.ge.s32.totalorder %s672_s14, 1  ;;  %p86_p7 = scmp.eq.s32.totalorder %s83_s20, 0 }
   0xb   : > { %p741_p8 = por %p105_p5, %p104_p3  ;;  %p139_p9 = scmp.lt.s32.totalorder %s672_s14, 3 }
   0xc   : > { %s747_s22 = scalar_select %p86_p7, %s660_s11, %s88_s18  }
   0xd   : > { %p140_p10 = pnand %p505_p6, %p139_p9 }
   0xe   : > { %p166_p11 = scmp.lt.s32.totalorder (!%p140_p10), %s664_s12, 1  ;;  %v674_v0 = vmov (!%p140_p10), 0.0   ;;  %vm196_vm0 = vcmask (!%p140_p10), 1043456   ;;  %v177_v3 = vld [vmem:[%s864_s1] sm:$0xff] (!%p140_p10)  ;;  %vm183_vm1 = vcmask (!%p140_p10), 31744   ;;  %v179_v4 = vld [vmem:[%s864_s1 + $0x10] sm:$0xff] (!%p140_p10) }
   0xf   : > { %143 = sbr.rel (%p140_p10) target bundleno = 577 (0x241), region = 28  ;;  %265 = vmatprep.mubr.f32.mxu0 (!%p140_p10), %v674_v0  ;;  %277 = vmatprep.mubr.f32.mxu1 (!%p140_p10), %v674_v0  ;;  %v178_v5 = vld [vmem:[%s864_s1 + $0x8] sm:$0xff] (!%p140_p10)  ;;  %v180_v6 = vld [vmem:[%s864_s1 + $0x18] sm:$0xff] (!%p140_p10)  ;;  %v675_v31 = vmov (!%p140_p10), 0   ;;  %s163_s8 = sand.u32 (!%p140_p10), 1, %s656_s10  }
  0x10   : > { %589 = vset.pattern.permute.xlu0 (!%p140_p10), %v675_v31  ;;  %590 = vset.pattern.permute.xlu1 (!%p140_p10), %v675_v31  ;;  %s506_s15 = sshll.u32 (!%p140_p10), %s163_s8, 6  ;;  %s527_s16 = sshll.u32 (!%p140_p10), %s664_s12, 10 }
  0x11   : > { %s165_s18 = scalar_lea.vmem (!%p140_p10), [#allocation2], %s506_s15  ;;  %s817_s25 = scalar_lea.sflag (!%p140_p10), [#allocation3], %s163_s8 }
  0x12   : > { %s412_s20 = sshll.u32 (!%p140_p10), %s165_s18, 4  ;;  %s807_s20 = int_to_ptr.vmem [resolvable:$true] %s412_s20 }
  0x13   : > { %s594_s26 = scalar_lea.vmem (!%p140_p10), %s807_s20, 1024 }
  0x14   : > { %p595_p12 = scmp.ne.s32.totalorder (!%p140_p10), %s807_s20, %s594_s26 }
  0x16   : > { %s167_s23 = scalar_select %p166_p11, %s664_s12, 1 }
  0x17   : > { %p596_p13 = pnand %p595_p12, %p734_p4 }
  0x18   : > { %s526_s24 = sshll.u32 %s167_s23, 3 }
  0x19   : > { %s170_s27 = scalar_lea.vmem %s863_s0, %s526_s24  ;;  %s805_s24 = scalar_lea.hbm %s865_s2, %s527_s16 }
  0x1a   : > { %v176_v1 = vld [vmem:[%s170_s27] sm:$0xff]  ;;  %p597_p0 = pneg %p596_p13  ;;  %s676_s27 = smov [#allocation2]  }
  0x1b   : > { %v182_v2 = vcombine.high %v176_v1, %v176_v1  ;;  %s598_s28 = sshll.u32 %s676_s27, 4  ;;  %s599_s28 = int_to_ptr.vmem [resolvable:$false] %s598_s28 }
  0x1c   : > { %s600_s29 = scalar_lea.vmem %s599_s28, 2048  ;;  %p601_p1 = scmp.lt.s32.totalorder %s807_s20, %s599_s28 }
  0x1d   : > { %509 = vmatprep.subr.msk.mxu0 %vm196_vm0, %v182_v2  ;;  %528 = vmatprep.subr.msk.mxu1 %vm196_vm0, %v182_v2  ;;  %p602_p2 = scmp.lt.s32.totalorder %s600_s29, %s594_s26 }
  0x1e   : > { %510 = vmatpush1.msk.msra.mxu0 %vm196_vm0, %v176_v1  ;;  %529 = vmatpush1.msk.msra.mxu1 %vm196_vm0, %v176_v1 }
  0x1f   : > { %511 = vmatmul.mubr.msk.f32.vlgmr.msra.gmra.mrb[0].mxu0 %vm183_vm1, %v177_v3  ;;  %513 = vmatmul.mubr.msk.f32.vlgmr.msra.gmra.mrb[0].mxu1 %vm183_vm1, %v179_v4  ;;  %p603_p3 = por %p602_p2, %p601_p1 }
  0x20   : > { %271 = vmatprep.mubr.f32.mxu0 %v674_v0  ;;  %283 = vmatprep.mubr.f32.mxu1 %v674_v0 }
  0x21   : > { %p604_p5 = pnand %p603_p3, %p597_p0 }
  0x23   : > { %512 = vmatmul.mubr.msk.f32.gmra.mrb[2].mxu0 %vm183_vm1, %v178_v5  ;;  %514 = vmatmul.mubr.msk.f32.gmra.mrb[2].mxu1 %vm183_vm1, %v180_v6 }
  0xf2   : > { %v766_v7 = vpop.f32.mrb[0].mxu0  ;;  %v768_v8 = vpop.f32.mrb[0].mxu1 }
  0xf3   : > { %v770_v9 = vpop.f32.mrb[1].mxu0  ;;  %v772_v10 = vpop.f32.mrb[1].mxu1  ;;  %v302_v11 = vmul.f32 %v766_v7, %v766_v7  ;;  %v306_v12 = vmul.f32 %v768_v8, %v768_v8 }
  0xf4   : > { %v296_v13 = vadd.f32 %v772_v10, %v768_v8  ;;  %v290_v14 = vadd.f32 %v770_v9, %v766_v7  ;;  %v303_v15 = vmul.f32 %v770_v9, %v770_v9  ;;  %v307_v16 = vmul.f32 %v772_v10, %v772_v10 }
  0xf6   : > { %297 = vadd.xlane.f32.xlu1 %v296_v13  ;;  %291 = vadd.xlane.f32.xlu0 %v290_v14  ;;  %v273_v17 = vpop.f32.mrb[2].mxu0  ;;  %v786_v18 = vpop.f32.mrb[2].mxu1  ;;  %v310_v19 = vadd.f32 %v303_v15, %v302_v11  ;;  %v316_v20 = vadd.f32 %v307_v16, %v306_v12 }
  0xf7   : > { %v275_v21 = vpop.f32.mrb[3].mxu0  ;;  %v287_v22 = vpop.f32.mrb[3].mxu1  ;;  %v304_v23 = vmul.f32 %v273_v17, %v273_v17  ;;  %v308_v24 = vmul.f32 %v786_v18, %v786_v18 }
  0xf8   : > { %v305_v25 = vmul.f32 %v275_v21, %v275_v21  ;;  %v293_v26 = vadd.f32 %v275_v21, %v273_v17  ;;  %v309_v27 = vmul.f32 %v287_v22, %v287_v22  ;;  %v299_v28 = vadd.f32 %v287_v22, %v786_v18 }
  0xfa   : > { %311 = vadd.xlane.f32.xlu1 %v310_v19  ;;  %294 = vadd.xlane.f32.xlu0 %v293_v26  ;;  %v313_v29 = vadd.f32 %v305_v25, %v304_v23  ;;  %v319_v30 = vadd.f32 %v309_v27, %v308_v24 }
  0xfe   : > { %300 = vadd.xlane.f32.xlu1 %v299_v28  ;;  %314 = vadd.xlane.f32.xlu0 %v313_v29 }
 0x102   : > { %320 = vadd.xlane.f32.xlu1 %v319_v30  ;;  %317 = vadd.xlane.f32.xlu0 %v316_v20 }
 0x183   : > { %v298_v32 = vpop.xlane.xlu1 %297  ;;  %v292_v33 = vpop.xlane.xlu0 %291 }
 0x187   : > { %v312_v34 = vpop.xlane.xlu1 %311  ;;  %v295_v35 = vpop.xlane.xlu0 %294 }
 0x188   : > { %v322_v36 = vadd.f32 %v295_v35, %v292_v33 }
 0x18a   : > { %v323_v37 = vadd.f32 %v322_v36, %v298_v32 }
 0x18b   : > { %v301_v38 = vpop.xlane.xlu1 %300  ;;  %v315_v39 = vpop.xlane.xlu0 %314 }
 0x18c   : > { %v324_v40 = vadd.f32 %v323_v37, %v301_v38  ;;  %v325_v42 = vadd.f32 %v315_v39, %v312_v34 }
 0x18e   : > { %v328_v41 = vmul.f32 0.0009765625, %v324_v40 }
 0x18f   : > { %v318_v43 = vpop.xlane.xlu0 %317  ;;  %v321_v45 = vpop.xlane.xlu1 %320 }
 0x190   : > { %v326_v44 = vadd.f32 %v325_v42, %v318_v43  ;;  %337 = vperm.xlu0 %589, %v328_v41   ;;  %v330_v47 = vmul.f32 %v328_v41, %v328_v41 }
 0x192   : > { %v327_v46 = vadd.f32 %v326_v44, %v321_v45 }
 0x194   : > { %v329_v48 = vmul.f32 0.0009765625, %v327_v46 }
 0x196   : > { %v331_v49 = vsub.f32 %v329_v48, %v330_v47 }
 0x198   : > { %v332_v50 = vmax.f32 %v331_v49, 0.0 }
 0x19a   : > { %v333_v51 = vadd.f32 1e-05, %v332_v50 }
 0x19c   : > { %592 = vrsqrt.f32 %v333_v51 }
 0x1a6   : > { %v593_v52 = vpop.eup %592 }
 0x1a7   : > { %350 = vperm.xlu1 %590, %v593_v52  }
 0x20f   : > { %v338_v53 = vpop.permute.xlu0 %337 }
 0x210   : > { %v340_v54 = vsub.f32 %v766_v7, %v338_v53  ;;  %v341_v55 = vsub.f32 %v770_v9, %v338_v53  ;;  %v342_v56 = vsub.f32 %v273_v17, %v338_v53  ;;  %v343_v57 = vsub.f32 %v275_v21, %v338_v53 }
 0x211   : > { %v344_v58 = vsub.f32 %v768_v8, %v338_v53  ;;  %v345_v59 = vsub.f32 %v772_v10, %v338_v53  ;;  %v346_v60 = vsub.f32 %v786_v18, %v338_v53  ;;  %v347_v61 = vsub.f32 %v287_v22, %v338_v53 }
 0x226   : > { %v351_v62 = vpop.permute.xlu1 %350 }
 0x227   : > { %v353_v63 = vmul.f32 %v351_v62, %v340_v54  ;;  %v354_v0 = vmul.f32 %v351_v62, %v341_v55  ;;  %v355_v1 = vmul.f32 %v351_v62, %v342_v56  ;;  %v356_v2 = vmul.f32 %v351_v62, %v343_v57 }
 0x228   : > { %v357_v3 = vmul.f32 %v351_v62, %v344_v58  ;;  %v358_v4 = vmul.f32 %v351_v62, %v345_v59  ;;  %v359_v5 = vmul.f32 %v351_v62, %v346_v60  ;;  %v360_v6 = vmul.f32 %v351_v62, %v347_v61 }
 0x229   : > { %vm361_vm2 = vcmp.ge.f32.partialorder %v353_v63, 0.0  ;;  %vm362_vm3 = vcmp.ge.f32.partialorder %v354_v0, 0.0  ;;  %vm363_vm4 = vcmp.ge.f32.partialorder %v355_v1, 0.0  ;;  %vm364_vm5 = vcmp.ge.f32.partialorder %v356_v2, 0.0 }
 0x22a   : > { %vm365_vm6 = vcmp.ge.f32.partialorder %v357_v3, 0.0  ;;  %vm366_vm7 = vcmp.ge.f32.partialorder %v358_v4, 0.0  ;;  %vm367_vm8 = vcmp.ge.f32.partialorder %v359_v5, 0.0  ;;  %vm368_vm9 = vcmp.ge.f32.partialorder %v360_v6, 0.0 }
 0x22b   : > { %v369_v7 = vmul.f32 0.2, %v353_v63  ;;  %v370_v8 = vmul.f32 0.2, %v354_v0  ;;  %v371_v9 = vmul.f32 0.2, %v355_v1 }
 0x22c   : > { %v372_v10 = vmul.f32 0.2, %v356_v2  ;;  %v373_v11 = vmul.f32 0.2, %v357_v3  ;;  %v374_v12 = vmul.f32 0.2, %v358_v4 }
 0x22d   : > { %v375_v13 = vmul.f32 0.2, %v359_v5  ;;  %v376_v14 = vmul.f32 0.2, %v360_v6  ;;  %v377_v15 = vsel %vm361_vm2, %v353_v63, %v369_v7  ;;  %v378_v16 = vsel %vm362_vm3, %v354_v0, %v370_v8 }
 0x22e   : > { %v379_v17 = vsel %vm363_vm4, %v355_v1, %v371_v9  ;;  %v380_v18 = vsel %vm364_vm5, %v356_v2, %v372_v10  ;;  %v381_v19 = vsel %vm365_vm6, %v357_v3, %v373_v11  ;;  %v382_v20 = vsel %vm366_vm7, %v358_v4, %v374_v12  ;;  %385 = vst [vmem:[%s165_s18] sm:$0xff] %v377_v15 }
 0x22f   : > { %386 = vst [vmem:[%s165_s18 + $0x8] sm:$0xff] %v378_v16  ;;  %v383_v21 = vsel %vm367_vm8, %v359_v5, %v375_v13  ;;  %v384_v22 = vsel %vm368_vm9, %v360_v6, %v376_v14  ;;  %515 = vst [vmem:[%s165_s18 + $0x10] sm:$0xff] %v379_v17 }
 0x230   : > { %516 = vst [vmem:[%s165_s18 + $0x18] sm:$0xff] %v380_v18  ;;  %517 = vst [vmem:[%s165_s18 + $0x20] sm:$0xff] %v381_v19 }
 0x231   : > { %518 = vst [vmem:[%s165_s18 + $0x28] sm:$0xff] %v382_v20  ;;  %519 = vst [vmem:[%s165_s18 + $0x30] sm:$0xff] %v383_v21 }
 0x232   : > { %520 = vst [vmem:[%s165_s18 + $0x38] sm:$0xff] %v384_v22 }
 0x233   : > { %607 = shalt.err (!%p604_p5)
}
 0x234   : > { %s608_s30 = scalar_lea.hbm %s805_s24, 1024  ;;  %s612_s5 = scalar_lea.hbm %s865_s2, 2048 }
 0x235   : > { %p609_p6 = scmp.ne.s32.totalorder %s805_s24, %s608_s30  ;;  %p613_p10 = scmp.lt.u32.totalorder %s805_s24, %s865_s2 }
 0x236   : > { %p614_p11 = scmp.lt.u32.totalorder %s612_s5, %s608_s30  ;;  %p616_p13 = scmp.lt.u32.totalorder %s608_s30, %s805_s24 }
 0x237   : > { %p610_p7 = pnand %p609_p6, %p734_p4 }
 0x238   : > { %p615_p12 = por %p614_p11, %p613_p10 }
 0x239   : > { %p611_p9 = pneg %p610_p7 }
 0x23a   : > { %p617_p0 = por %p616_p13, %p615_p12 }
 0x23c   : > { %p618_p1 = pnand %p617_p0, %p611_p9 }
 0x23e   : > { %621 = shalt.err (!%p618_p1)
}
 0x23f   : > { %s677_s8 = smov 256   ;;  %s678_s15 = smov 16  }
 0x240   : > { %530 = dma.vmem_to_hbm [thread:$0]  (%p734_p4), %s807_s20, 1024, %s805_s24, %s817_s25, %s677_s8, %s677_s8, %s678_s15  }
 0x241 PF: > { %p536_p2 = scmp.ge.s32.totalorder %s672_s14, 2  ;;  %s427_s16 = sand.u32 1, %s652_s9  }
 0x242   : > { %s428_s18 = scalar_lea.sflag [#allocation3], %s427_s16 }
 0x243   : > { %p533_p3 = pnand %p536_p2, %p741_p8 }
 0x245   : > { %647 = dma.done.wait (!%p533_p3), %s428_s18, 1024  }
 0x246   : > { %649 = vsyncadd (!%p533_p3), %s428_s18, 4294966272  ;;  %s15_s14 = sadd.s32 1, %s672_s14   ;;  %s868_s9 = smov %s656_s10 }
 0x247   : > { %p12_p5 = scmp.ge.s32.totalorder %s15_s14, 4   ;;  %s869_s10 = smov %s660_s11 }
 0x248   : > { %s870_s11 = smov %s747_s22  ;;  %s871_s12 = smov %s668_s13 }
 0x249   : > { %s872_s13 = smov %s874_s17  ;;  %14 = sbr.rel (!%p12_p5) target bundleno = 4 (0x4), region = 69 }
 0x250   :  { %433 = vsyncpa [#allocation3], 1 }
 0x251   :  { %435 = vsyncpa [#allocation3 + $0x1], 1 }

</bundles_post_ra>
